<compile_context>
chip_gen: v6e
topology: v6e:2x2x1
jax: 0.10.0
libtpu: 0.0.40
codegen_flags: <defaults>
</compile_context>

<pallas_src>
import functools

import jax
import jax.numpy as jnp
from jax.experimental import pallas as pl
from jax.experimental.pallas import tpu as pltpu


def dqn_kernel(x_ref, w1_ref, b1_ref, w2_ref, b2_ref, w3_ref, b3_ref, o_ref):
    # Layer 1: Linear + ReLU (bf16 operands, f32 accumulation, f32 bias add).
    h1 = jnp.dot(x_ref[...], w1_ref[...], preferred_element_type=jnp.float32)
    h1 = jnp.maximum(h1 + b1_ref[...], 0.0).astype(w2_ref.dtype)
    # Layer 2: Linear + ReLU.
    h2 = jnp.dot(h1, w2_ref[...], preferred_element_type=jnp.float32)
    h2 = jnp.maximum(h2 + b2_ref[...], 0.0).astype(w3_ref.dtype)
    # Layer 3: Linear (Q-values, no activation). Output is lane-padded to 128.
    q = jnp.dot(h2, w3_ref[...], preferred_element_type=jnp.float32) + b3_ref[...]
    o_ref[...] = q.astype(o_ref.dtype)


@functools.partial(jax.jit, static_argnames=("block_b",))
def dqn_forward(x, params, block_b=512):
    """x: (B, S) float32.  params: dict of weights/biases. Returns (B, A) float32.

    Note: for very small batches (B < ~128) a plain XLA GEMM is already optimal;
    this kernel pays off once the batch tile can fill MXU rows.
    """
    w1, b1, w2, b2, w3, b3 = (params["w1"], params["b1"], params["w2"],
                              params["b2"], params["w3"], params["b3"])
    B, S = x.shape
    M = w1.shape[1]
    A = w3.shape[1]

    # Lane-dense output: pad the Q-value dimension up to a multiple of 128 so
    # the final store is an unmasked full-lane vst. Extra columns are zeros and
    # are sliced off after the call.
    A_pad = 128 * pl.cdiv(A, 128)
    if A_pad != A:
        w3 = jnp.pad(w3, ((0, 0), (0, A_pad - A)))
        b3 = jnp.pad(b3, ((0, 0), (0, A_pad - A)))

    # bf16 operands for the MXU; biases (added after f32 accumulation) stay f32.
    cdt = jnp.bfloat16
    xc = x.astype(cdt)
    w1c, w2c, w3c = w1.astype(cdt), w2.astype(cdt), w3.astype(cdt)
    b1c, b2c, b3c = (b1.astype(jnp.float32), b2.astype(jnp.float32),
                     b3.astype(jnp.float32))

    # Pick the batch tile: as large as requested but never larger than B, and
    # prefer at least 2 grid steps so both TensorCores on v7x get work.
    block_b = min(block_b, B)
    if block_b == B and B % 16 == 0:
        block_b = B // 2
    assert B % block_b == 0, "batch must be a multiple of the batch tile"
    grid = (B // block_b,)

    flops = 2 * B * (S * M + M * M + M * A_pad)
    bytes_accessed = (B * S * 2                      # x (bf16)
                      + (S * M + M * M + M * A_pad) * 2   # weights (bf16)
                      + (2 * M + A_pad) * 4          # biases (f32)
                      + B * A_pad * 4)               # output (f32)

    out = pl.pallas_call(
        dqn_kernel,
        out_shape=jax.ShapeDtypeStruct((B, A_pad), jnp.float32),
        grid_spec=pltpu.PrefetchScalarGridSpec(
            num_scalar_prefetch=0,
            grid=grid,
            in_specs=[
                # activations: tiled over the batch axis
                pl.BlockSpec((block_b, S), lambda i: (i, 0)),
                # parameters: full arrays; constant index_map -> fetched once,
                # never re-DMA'd across grid steps (~75 KB total, VMEM-trivial)
                pl.BlockSpec((S, M), lambda i: (0, 0)),
                pl.BlockSpec((1, M), lambda i: (0, 0)),
                pl.BlockSpec((M, M), lambda i: (0, 0)),
                pl.BlockSpec((1, M), lambda i: (0, 0)),
                pl.BlockSpec((M, A_pad), lambda i: (0, 0)),
                pl.BlockSpec((1, A_pad), lambda i: (0, 0)),
            ],
            out_specs=pl.BlockSpec((block_b, A_pad), lambda i: (i, 0)),
        ),
        compiler_params=pltpu.CompilerParams(
            dimension_semantics=("parallel",)),
        cost_estimate=pl.CostEstimate(flops=flops, transcendentals=0,
                                      bytes_accessed=bytes_accessed),
    )(xc, w1c, b1c, w2c, b2c, w3c, b3c)
    return out[:, :A]


def init_params(key, state_size, action_size, mid_dim=128, dtype=jnp.float32):
    """Deterministic PyTorch-style (uniform +-1/sqrt(fan_in)) initialization."""
    def linear(k, fan_in, fan_out):
        kw, kb = jax.random.split(k)
        bound = 1.0 / jnp.sqrt(fan_in)
        w = jax.random.uniform(kw, (fan_in, fan_out), dtype, -bound, bound)
        b = jax.random.uniform(kb, (1, fan_out), dtype, -bound, bound)
        return w, b

    k1, k2, k3 = jax.random.split(key, 3)
    w1, b1 = linear(k1, state_size, mid_dim)
    w2, b2 = linear(k2, mid_dim, mid_dim)
    w3, b3 = linear(k3, mid_dim, action_size)
    return dict(w1=w1, b1=b1, w2=w2, b2=b2, w3=w3, b3=b3)


def dqn_reference(x, params):
    h1 = jnp.maximum(x @ params["w1"] + params["b1"], 0.0)
    h2 = jnp.maximum(h1 @ params["w2"] + params["b2"], 0.0)
    return h2 @ params["w3"] + params["b3"]


if __name__ == "__main__":
    state_size = 16
    action_size = 4
    mid_dim = 128
    batch = 256  # small smoke-test batch; yields a 2-step parallel grid

    key = jax.random.PRNGKey(0)
    kx, kp = jax.random.split(key)
    x = jax.random.normal(kx, (batch, state_size), dtype=jnp.float32)
    params = init_params(kp, state_size, action_size, mid_dim)

    out = dqn_forward(x, params)
    out = jax.block_until_ready(out)

    ref = dqn_reference(x, params)
    assert out.shape == (batch, action_size)
    # bf16 MXU operands with f32 accumulation vs. a pure-f32 reference.
    assert jnp.allclose(out, ref, atol=5e-2, rtol=5e-2), "mismatch vs reference"
    print("KERNEL_OK")
</pallas_src>

<mosaic_0001>
module attributes {stable_mosaic.version = 11 : i64} {
  func.func @dqn_kernel(%arg0: i32, %arg1: memref<128x16xbf16, #tpu.memory_space<vmem>>, %arg2: memref<16x128xbf16, #tpu.memory_space<vmem>>, %arg3: memref<1x128xf32, #tpu.memory_space<vmem>>, %arg4: memref<128x128xbf16, #tpu.memory_space<vmem>>, %arg5: memref<1x128xf32, #tpu.memory_space<vmem>>, %arg6: memref<128x128xbf16, #tpu.memory_space<vmem>>, %arg7: memref<1x128xf32, #tpu.memory_space<vmem>>, %arg8: memref<128x128xf32, #tpu.memory_space<vmem>>) attributes {dimension_semantics = [#tpu.dimension_semantics<parallel>], iteration_bounds = array<i64: 2>, scalar_prefetch = 0 : i64, scratch_operands = 0 : i64, tpu.core_type = #tpu.core_type<tc>, window_params = [{transform_indices = @transform_0, window_bounds = array<i64: 128, 16>}, {pipeline_mode = #tpu.pipeline_mode<synchronous>, transform_indices = @transform_1, window_bounds = array<i64: 16, 128>}, {pipeline_mode = #tpu.pipeline_mode<synchronous>, transform_indices = @transform_2, window_bounds = array<i64: 1, 128>}, {pipeline_mode = #tpu.pipeline_mode<synchronous>, transform_indices = @transform_3, window_bounds = array<i64: 128, 128>}, {pipeline_mode = #tpu.pipeline_mode<synchronous>, transform_indices = @transform_4, window_bounds = array<i64: 1, 128>}, {pipeline_mode = #tpu.pipeline_mode<synchronous>, transform_indices = @transform_5, window_bounds = array<i64: 128, 128>}, {pipeline_mode = #tpu.pipeline_mode<synchronous>, transform_indices = @transform_6, window_bounds = array<i64: 1, 128>}, {transform_indices = @transform_7, window_bounds = array<i64: 128, 128>}]} {
    %c0 = arith.constant 0 : index
    %c0_0 = arith.constant 0 : index
    %0 = vector.load %arg1[%c0, %c0_0] : memref<128x16xbf16, #tpu.memory_space<vmem>>, vector<128x16xbf16>
    %c0_1 = arith.constant 0 : index
    %c0_2 = arith.constant 0 : index
    %1 = vector.load %arg2[%c0_1, %c0_2] : memref<16x128xbf16, #tpu.memory_space<vmem>>, vector<16x128xbf16>
    %cst = arith.constant dense<0.000000e+00> : vector<128x128xf32>
    %2 = tpu.matmul %0, %1, %cst {dimension_numbers = #tpu.dot_dimension_numbers<[1], [0], [0], [1], [0, 0, 1, 1], [], []>} : vector<128x16xbf16>, vector<16x128xbf16>, vector<128x128xf32> -> vector<128x128xf32>
    %c0_3 = arith.constant 0 : index
    %c0_4 = arith.constant 0 : index
    %3 = vector.load %arg3[%c0_3, %c0_4] : memref<1x128xf32, #tpu.memory_space<vmem>>, vector<1x128xf32>
    %4 = vector.broadcast %3 : vector<1x128xf32> to vector<128x128xf32>
    %5 = arith.addf %2, %4 : vector<128x128xf32>
    %cst_5 = arith.constant 0.000000e+00 : f32
    %6 = vector.broadcast %cst_5 : f32 to vector<128x128xf32>
    %7 = arith.maximumf %5, %6 : vector<128x128xf32>
    %8 = arith.truncf %7 : vector<128x128xf32> to vector<128x128xbf16>
    %c0_6 = arith.constant 0 : index
    %c0_7 = arith.constant 0 : index
    %9 = vector.load %arg4[%c0_6, %c0_7] : memref<128x128xbf16, #tpu.memory_space<vmem>>, vector<128x128xbf16>
    %cst_8 = arith.constant dense<0.000000e+00> : vector<128x128xf32>
    %10 = tpu.matmul %8, %9, %cst_8 {dimension_numbers = #tpu.dot_dimension_numbers<[1], [0], [0], [1], [0, 0, 1, 1], [], []>} : vector<128x128xbf16>, vector<128x128xbf16>, vector<128x128xf32> -> vector<128x128xf32>
    %c0_9 = arith.constant 0 : index
    %c0_10 = arith.constant 0 : index
    %11 = vector.load %arg5[%c0_9, %c0_10] : memref<1x128xf32, #tpu.memory_space<vmem>>, vector<1x128xf32>
    %12 = vector.broadcast %11 : vector<1x128xf32> to vector<128x128xf32>
    %13 = arith.addf %10, %12 : vector<128x128xf32>
    %cst_11 = arith.constant 0.000000e+00 : f32
    %14 = vector.broadcast %cst_11 : f32 to vector<128x128xf32>
    %15 = arith.maximumf %13, %14 : vector<128x128xf32>
    %16 = arith.truncf %15 : vector<128x128xf32> to vector<128x128xbf16>
    %c0_12 = arith.constant 0 : index
    %c0_13 = arith.constant 0 : index
    %17 = vector.load %arg6[%c0_12, %c0_13] : memref<128x128xbf16, #tpu.memory_space<vmem>>, vector<128x128xbf16>
    %cst_14 = arith.constant dense<0.000000e+00> : vector<128x128xf32>
    %18 = tpu.matmul %16, %17, %cst_14 {dimension_numbers = #tpu.dot_dimension_numbers<[1], [0], [0], [1], [0, 0, 1, 1], [], []>} : vector<128x128xbf16>, vector<128x128xbf16>, vector<128x128xf32> -> vector<128x128xf32>
    %c0_15 = arith.constant 0 : index
    %c0_16 = arith.constant 0 : index
    %19 = vector.load %arg7[%c0_15, %c0_16] : memref<1x128xf32, #tpu.memory_space<vmem>>, vector<1x128xf32>
    %20 = vector.broadcast %19 : vector<1x128xf32> to vector<128x128xf32>
    %21 = arith.addf %18, %20 : vector<128x128xf32>
    %c0_17 = arith.constant 0 : index
    %c0_18 = arith.constant 0 : index
    %22 = vector.load %arg8[%c0_17, %c0_18] : memref<128x128xf32, #tpu.memory_space<vmem>>, vector<128x128xf32>
    tpu.vector_store %arg8[%c0_17, %c0_18], %21 {strides = array<i32>} : memref<128x128xf32, #tpu.memory_space<vmem>>, vector<128x128xf32>,
    return
  }
  func.func @transform_0(%arg0: i32) -> (i32, i32) {
    %c0_i32 = arith.constant 0 : i32
    %c0_i32_0 = arith.constant 0 : i32
    return %arg0, %c0_i32 : i32, i32
  }
  func.func @transform_1(%arg0: i32) -> (i32, i32) {
    %c0_i32 = arith.constant 0 : i32
    %c0_i32_0 = arith.constant 0 : i32
    %c0_i32_1 = arith.constant 0 : i32
    return %c0_i32, %c0_i32_0 : i32, i32
  }
  func.func @transform_2(%arg0: i32) -> (i32, i32) {
    %c0_i32 = arith.constant 0 : i32
    %c0_i32_0 = arith.constant 0 : i32
    %c0_i32_1 = arith.constant 0 : i32
    return %c0_i32, %c0_i32_0 : i32, i32
  }
  func.func @transform_3(%arg0: i32) -> (i32, i32) {
    %c0_i32 = arith.constant 0 : i32
    %c0_i32_0 = arith.constant 0 : i32
    %c0_i32_1 = arith.constant 0 : i32
    return %c0_i32, %c0_i32_0 : i32, i32
  }
  func.func @transform_4(%arg0: i32) -> (i32, i32) {
    %c0_i32 = arith.constant 0 : i32
    %c0_i32_0 = arith.constant 0 : i32
    %c0_i32_1 = arith.constant 0 : i32
    return %c0_i32, %c0_i32_0 : i32, i32
  }
  func.func @transform_5(%arg0: i32) -> (i32, i32) {
    %c0_i32 = arith.constant 0 : i32
    %c0_i32_0 = arith.constant 0 : i32
    %c0_i32_1 = arith.constant 0 : i32
    return %c0_i32, %c0_i32_0 : i32, i32
  }
  func.func @transform_6(%arg0: i32) -> (i32, i32) {
    %c0_i32 = arith.constant 0 : i32
    %c0_i32_0 = arith.constant 0 : i32
    %c0_i32_1 = arith.constant 0 : i32
    return %c0_i32, %c0_i32_0 : i32, i32
  }
  func.func @transform_7(%arg0: i32) -> (i32, i32) {
    %c0_i32 = arith.constant 0 : i32
    %c0_i32_0 = arith.constant 0 : i32
    return %arg0, %c0_i32 : i32, i32
  }
}

</mosaic_0001>

<bundles_post_ra>
// kernel: dqn_forward.1
= control target key start
LH: loop header
LB: loop body
LE: loop exit
PB: predicated region body
PF: predicated region fallthrough
CT: control target
= control target key end

     0   :  { %s1183_s24 = smov 0   ;;  %s1290_s0 = inlined_call_operand.vmem [shape: bf16[256,16], index: 0, kind: input, shape index: {}]   ;;  %s1291_s1 = inlined_call_operand.vmem [shape: bf16[16,128], index: 1, kind: input, shape index: {}]   ;;  %s1292_s2 = inlined_call_operand.vmem [shape: f32[1,128], index: 2, kind: input, shape index: {}]   ;;  %s1293_s3 = inlined_call_operand.vmem [shape: bf16[128,128], index: 3, kind: input, shape index: {}]   ;;  %s1294_s4 = inlined_call_operand.vmem [shape: f32[1,128], index: 4, kind: input, shape index: {}]   ;;  %s1295_s5 = inlined_call_operand.vmem [shape: bf16[128,128], index: 5, kind: input, shape index: {}]   ;;  %s1296_s6 = inlined_call_operand.vmem [shape: f32[1,128], index: 6, kind: input, shape index: {}]   ;;  %s1297_s7 = inlined_call_operand.vmem [shape: f32[256,128], index: 7, kind: output, shape index: {}]  }
   0x1 LB: > { %s932_s25 = sadd.s32 4294967295, %s1141_s24   ;;  %p936_p0 = scmp.ge.s32.totalorder %s1141_s24, 1  ;;  %s1141_s24 = sphi %s1183_s24, %s17_s24  }
   0x2   : > { %p238_p1 = scmp.lt.s32.totalorder %s1141_s24, 3 }
   0x4   : > { %p239_p2 = pnand %p936_p0, %p238_p1 }
   0x5   : > { %s937_s28 = sshll.u32 (!%p239_p2), %s932_s25, 4 }
   0x6   : > { %242 = sbr.rel (%p239_p2) target bundleno = 654 (0x28e), region = 48  ;;  %p271_p3 = scmp.lt.s32.totalorder (!%p239_p2), %s937_s28, 31 }
   0xb   : > { %v1110_v0 = vld [vmem:[%s1291_s1] sm:$0xff]   ;;  %v1119_v1 = vld [vmem:[%s1293_s3 + $0x38] sm:$0xff]   ;;  %s1299_s28 = smov (!%p271_p3, %s937_s28), 31  ;;  %v1120_v2 = vld [vmem:[%s1293_s3 + $0x30] sm:$0xff]   ;;  %vm354_vm0 = vcmask 130048  }
   0xc   : > { %1020 = vmatprep.subr.bf16.mxu0 %v1110_v0  ;;  %1038 = vmatprep.subr.bf16.mxu1 %v1119_v1  ;;  %s938_s10 = sshll.u32 %s1299_s28, 2  ;;  %v1121_v3 = vld [vmem:[%s1293_s3 + $0x28] sm:$0xff]   ;;  %v1122_v7 = vld [vmem:[%s1293_s3 + $0x20] sm:$0xff]   ;;  %v1123_v8 = vld [vmem:[%s1293_s3 + $0x18] sm:$0xff]   ;;  %s940_s26 = sshll.u32 %s1299_s28, 3 }
   0xd   : > { %1021 = vmatpush3.bf16.msra.mxu0 %v1110_v0  ;;  %1039 = vmatpush3.bf16.msra.mxu1 %v1119_v1  ;;  %s274_s13 = scalar_lea.vmem %s1290_s0, %s938_s10  ;;  %v1124_v14 = vld [vmem:[%s1293_s3 + $0x10] sm:$0xff]   ;;  %v1125_v15 = vld [vmem:[%s1293_s3 + $0x8] sm:$0xff]   ;;  %v1126_v16 = vld [vmem:[%s1293_s3] sm:$0xff]   ;;  %s1269_s9 = scalar_lea.vmem %s1297_s7, %s940_s26 }
   0xe   : > { %1040 = vmatprep.subr.bf16.mxu1 %v1120_v2  ;;  %v1111_v4 = vld [vmem:[%s274_s13] sm:$0xff]   ;;  %v1112_v5 = vld [vmem:[%s274_s13 + $0x8] sm:$0xff]   ;;  %v1113_v6 = vld [vmem:[%s274_s13 + $0x10] sm:$0xff]  }
   0xf   : > { %1022 = vmatprep.mubr.msk.bf16.mxu0 %vm354_vm0, %v1111_v4  ;;  %v1114_v9 = vld [vmem:[%s274_s13 + $0x18] sm:$0xff]   ;;  %v1115_v10 = vld [vmem:[%s274_s13 + $0x20] sm:$0xff]   ;;  %v1116_v11 = vld [vmem:[%s274_s13 + $0x28] sm:$0xff]  }
  0x10   : > { %1023 = vmatmul.mubr.msk.bf16.vlgmr.msra.gmra.mxu0 %vm354_vm0, %v1112_v5  ;;  %v1117_v12 = vld [vmem:[%s274_s13 + $0x30] sm:$0xff]   ;;  %v1118_v13 = vld [vmem:[%s274_s13 + $0x38] sm:$0xff]   ;;  %v1129_v19 = vld [vmem:[%s1295_s5 + $0x28] sm:$0xff]  }
  0x11   : > { %1041 = vmatpush3.bf16.msra.mxu1 %v1120_v2  ;;  %1026 = vmatprep.mubr.msk.bf16.mxu0 %vm354_vm0, %v1113_v6  ;;  %v1127_v17 = vld [vmem:[%s1295_s5 + $0x38] sm:$0xff]   ;;  %v1128_v18 = vld [vmem:[%s1295_s5 + $0x30] sm:$0xff]   ;;  %v1130_v20 = vld [vmem:[%s1295_s5 + $0x20] sm:$0xff]  }
  0x12   : > { %1042 = vmatprep.subr.bf16.mxu1 %v1121_v3  ;;  %1070 = vmatprep.subr.bf16.mxu0 %v1127_v17  ;;  %v1131_v21 = vld [vmem:[%s1295_s5 + $0x18] sm:$0xff]   ;;  %v941_v24 = vld [vmem:[%s1292_s2] ss:$0 sm:$0xff] }
  0x13   : > { %1071 = vmatpush3.bf16.msra.mxu0 %v1127_v17  ;;  %v1134_v17 = vld [vmem:[%s1295_s5] sm:$0xff]  }
  0x14   : > { %1072 = vmatprep.subr.bf16.mxu0 %v1128_v18 }
  0x15   : > { %1043 = vmatpush3.bf16.msra.mxu1 %v1121_v3 }
  0x16   : > { %1044 = vmatprep.subr.bf16.mxu1 %v1122_v7 }
  0x17   : > { %1073 = vmatpush3.bf16.msra.mxu0 %v1128_v18 }
  0x18   : > { %1027 = vmatmul.mubr.msk.bf16.gmra.mxu0 %vm354_vm0, %v1114_v9  ;;  %1074 = vmatprep.subr.bf16.mxu0 %v1129_v19 }
  0x19   : > { %1045 = vmatpush3.bf16.msra.mxu1 %v1122_v7  ;;  %1030 = vmatprep.mubr.msk.bf16.mxu0 %vm354_vm0, %v1115_v10 }
  0x1a   : > { %1046 = vmatprep.subr.bf16.mxu1 %v1123_v8 }
  0x1b   : > { %1075 = vmatpush3.bf16.msra.mxu0 %v1129_v19 }
  0x1c   : > { %1076 = vmatprep.subr.bf16.mxu0 %v1130_v20 }
  0x1d   : > { %1047 = vmatpush3.bf16.msra.mxu1 %v1123_v8 }
  0x1e   : > { %1048 = vmatprep.subr.bf16.mxu1 %v1124_v14 }
  0x1f   : > { %1077 = vmatpush3.bf16.msra.mxu0 %v1130_v20  ;;  %v959_v20 = vld [vmem:[%s1294_s4] ss:$0 sm:$0xff] }
  0x20   : > { %1031 = vmatmul.mubr.msk.bf16.gmra.mxu0 %vm354_vm0, %v1116_v11  ;;  %1078 = vmatprep.subr.bf16.mxu0 %v1131_v21 }
  0x21   : > { %1034 = vmatprep.mubr.msk.bf16.mxu0 %vm354_vm0, %v1117_v12  ;;  %1049 = vmatpush3.bf16.msra.mxu1 %v1124_v14 }
  0x22   : > { %1050 = vmatprep.subr.bf16.mxu1 %v1125_v15 }
  0x23   : > { %1079 = vmatpush3.bf16.msra.mxu0 %v1131_v21 }
  0x25   : > { %1051 = vmatpush3.bf16.msra.mxu1 %v1125_v15  ;;  %v1132_v15 = vld [vmem:[%s1295_s5 + $0x10] sm:$0xff]  }
  0x26   : > { %1052 = vmatprep.subr.bf16.mxu1 %v1126_v16  ;;  %1080 = vmatprep.subr.bf16.mxu0 %v1132_v15 }
  0x27   : > { %1081 = vmatpush3.bf16.msra.mxu0 %v1132_v15 }
  0x28   : > { %1035 = vmatmul.mubr.msk.bf16.gmra.mxu0 %vm354_vm0, %v1118_v13 }
  0x29   : > { %1053 = vmatpush3.bf16.msra.mxu1 %v1126_v16  ;;  %v1133_v16 = vld [vmem:[%s1295_s5 + $0x8] sm:$0xff]  }
  0x2a   : > { %1082 = vmatprep.subr.bf16.mxu0 %v1133_v16 }
  0x2b   : > { %1083 = vmatpush3.bf16.msra.mxu0 %v1133_v16 }
  0x2c   : > { %1084 = vmatprep.subr.bf16.mxu0 %v1134_v17 }
  0x2f   : > { %1085 = vmatpush3.bf16.msra.mxu0 %v1134_v17 }
  0xd0   : > { %v1024_v22 = vpop.f32.mrf.mxu0 }
  0xd1   : > { %v422_v28 = vadd.f32 %v1024_v22, %v941_v24 }
  0xd2   : > { %v413_v23 = vpop.f32.mrf.mxu0 }
  0xd3   : > { %v414_v26 = vadd.f32 %v941_v24, %v413_v23  ;;  %v478_v35 = vmax.f32 %v422_v28, 0.0 }
  0xd4   : > { %v1025_v25 = vpop.f32.mrf.mxu0 }
  0xd5   : > { %v425_v27 = vadd.f32 %v1025_v25, %v941_v24  ;;  %v476_v33 = vmax.f32 %v414_v26, 0.0 }
  0xd6   : > { %v416_v29 = vpop.f32.mrf.mxu0 }
  0xd7   : > { %v417_v30 = vadd.f32 %v941_v24, %v416_v29  ;;  %v479_v31 = vmax.f32 %v425_v27, 0.0 }
  0xd8   : > { %v1028_v32 = vpop.f32.mrf.mxu0 }
  0xd9   : > { %v477_v34 = vmax.f32 %v417_v30, 0.0  ;;  %v493_v38 = vpack.c.bf16 %v479_v31, %v478_v35  ;;  %v438_v42 = vadd.f32 %v1028_v32, %v941_v24 }
  0xda   : > { %v429_v36 = vpop.f32.mrf.mxu0 }
  0xdb   : > { %v492_v37 = vpack.c.bf16 %v477_v34, %v476_v33  ;;  %v430_v40 = vadd.f32 %v941_v24, %v429_v36  ;;  %v482_v49 = vmax.f32 %v438_v42, 0.0 }
  0xdc   : > { %v1029_v39 = vpop.f32.mrf.mxu0 }
  0xdd   : > { %v441_v41 = vadd.f32 %v1029_v39, %v941_v24  ;;  %1054 = vmatprep.mubr.bf16.mxu1 %v492_v37  ;;  %v480_v47 = vmax.f32 %v430_v40, 0.0 }
  0xde   : > { %v432_v43 = vpop.f32.mrf.mxu0  ;;  %1055 = vmatmul.mubr.bf16.vlgmr.msra.gmra.mxu1 %v493_v38 }
  0xdf   : > { %v433_v44 = vadd.f32 %v941_v24, %v432_v43  ;;  %v483_v45 = vmax.f32 %v441_v41, 0.0 }
  0xe0   : > { %v1032_v46 = vpop.f32.mrf.mxu0 }
  0xe1   : > { %v481_v48 = vmax.f32 %v433_v44, 0.0  ;;  %v495_v52 = vpack.c.bf16 %v483_v45, %v482_v49  ;;  %v454_v56 = vadd.f32 %v1032_v46, %v941_v24 }
  0xe2   : > { %v445_v50 = vpop.f32.mrf.mxu0 }
  0xe3   : > { %v494_v51 = vpack.c.bf16 %v481_v48, %v480_v47  ;;  %v446_v54 = vadd.f32 %v941_v24, %v445_v50  ;;  %v486_v63 = vmax.f32 %v454_v56, 0.0 }
  0xe4   : > { %v1033_v53 = vpop.f32.mrf.mxu0 }
  0xe5   : > { %v457_v55 = vadd.f32 %v1033_v53, %v941_v24  ;;  %1058 = vmatprep.mubr.bf16.mxu1 %v494_v51  ;;  %v484_v61 = vmax.f32 %v446_v54, 0.0 }
  0xe6   : > { %v448_v57 = vpop.f32.mrf.mxu0  ;;  %1059 = vmatmul.mubr.bf16.gmra.mxu1 %v495_v52 }
  0xe7   : > { %v449_v58 = vadd.f32 %v941_v24, %v448_v57  ;;  %v487_v59 = vmax.f32 %v457_v55, 0.0 }
  0xe8   : > { %v1036_v60 = vpop.f32.mrf.mxu0 }
  0xe9   : > { %v485_v62 = vmax.f32 %v449_v58, 0.0  ;;  %v497_v2 = vpack.c.bf16 %v487_v59, %v486_v63  ;;  %v470_v6 = vadd.f32 %v1036_v60, %v941_v24 }
  0xea   : > { %v461_v0 = vpop.f32.mrf.mxu0 }
  0xeb   : > { %v496_v1 = vpack.c.bf16 %v485_v62, %v484_v61  ;;  %v462_v4 = vadd.f32 %v941_v24, %v461_v0  ;;  %v490_v12 = vmax.f32 %v470_v6, 0.0 }
  0xec   : > { %v1037_v3 = vpop.f32.mrf.mxu0 }
  0xed   : > { %v473_v5 = vadd.f32 %v1037_v3, %v941_v24  ;;  %1062 = vmatprep.mubr.bf16.mxu1 %v496_v1  ;;  %v488_v10 = vmax.f32 %v462_v4, 0.0 }
  0xee   : > { %v464_v7 = vpop.f32.mrf.mxu0  ;;  %1063 = vmatmul.mubr.bf16.gmra.mxu1 %v497_v2 }
  0xef   : > { %v465_v8 = vadd.f32 %v941_v24, %v464_v7  ;;  %v491_v9 = vmax.f32 %v473_v5, 0.0 }
  0xf1   : > { %v489_v11 = vmax.f32 %v465_v8, 0.0  ;;  %v499_v14 = vpack.c.bf16 %v491_v9, %v490_v12 }
  0xf3   : > { %v498_v13 = vpack.c.bf16 %v489_v11, %v488_v10  ;;  %v968_v11 = vld [vmem:[%s1296_s6] ss:$0 sm:$0xff] }
  0xf5   : > { %1066 = vmatprep.mubr.bf16.mxu1 %v498_v13 }
  0xf6   : > { %1067 = vmatmul.mubr.bf16.gmra.mxu1 %v499_v14 }
 0x19e   : > { %v1056_v18 = vpop.f32.mrf.mxu1 }
 0x19f   : > { %v614_v24 = vadd.f32 %v1056_v18, %v959_v20 }
 0x1a0   : > { %v605_v19 = vpop.f32.mrf.mxu1 }
 0x1a1   : > { %v606_v22 = vadd.f32 %v959_v20, %v605_v19  ;;  %v670_v31 = vmax.f32 %v614_v24, 0.0 }
 0x1a2   : > { %v1057_v21 = vpop.f32.mrf.mxu1 }
 0x1a3   : > { %v617_v23 = vadd.f32 %v1057_v21, %v959_v20  ;;  %v668_v29 = vmax.f32 %v606_v22, 0.0 }
 0x1a4   : > { %v608_v25 = vpop.f32.mrf.mxu1 }
 0x1a5   : > { %v609_v26 = vadd.f32 %v959_v20, %v608_v25  ;;  %v671_v27 = vmax.f32 %v617_v23, 0.0 }
 0x1a6   : > { %v1060_v28 = vpop.f32.mrf.mxu1 }
 0x1a7   : > { %v669_v30 = vmax.f32 %v609_v26, 0.0  ;;  %v685_v34 = vpack.c.bf16 %v671_v27, %v670_v31  ;;  %v630_v38 = vadd.f32 %v1060_v28, %v959_v20 }
 0x1a8   : > { %v621_v32 = vpop.f32.mrf.mxu1 }
 0x1a9   : > { %v684_v33 = vpack.c.bf16 %v669_v30, %v668_v29  ;;  %v622_v36 = vadd.f32 %v959_v20, %v621_v32  ;;  %v674_v45 = vmax.f32 %v630_v38, 0.0 }
 0x1aa   : > { %v1061_v35 = vpop.f32.mrf.mxu1 }
 0x1ab   : > { %v633_v37 = vadd.f32 %v1061_v35, %v959_v20  ;;  %1086 = vmatprep.mubr.bf16.mxu0 %v684_v33  ;;  %v672_v43 = vmax.f32 %v622_v36, 0.0 }
 0x1ac   : > { %v624_v39 = vpop.f32.mrf.mxu1  ;;  %1087 = vmatmul.mubr.bf16.vlgmr.msra.gmra.mxu0 %v685_v34 }
 0x1ad   : > { %v625_v40 = vadd.f32 %v959_v20, %v624_v39  ;;  %v675_v41 = vmax.f32 %v633_v37, 0.0 }
 0x1ae   : > { %v1064_v42 = vpop.f32.mrf.mxu1 }
 0x1af   : > { %v673_v44 = vmax.f32 %v625_v40, 0.0  ;;  %v687_v48 = vpack.c.bf16 %v675_v41, %v674_v45  ;;  %v646_v52 = vadd.f32 %v1064_v42, %v959_v20 }
 0x1b0   : > { %v637_v46 = vpop.f32.mrf.mxu1 }
 0x1b1   : > { %v686_v47 = vpack.c.bf16 %v673_v44, %v672_v43  ;;  %v638_v50 = vadd.f32 %v959_v20, %v637_v46  ;;  %v678_v59 = vmax.f32 %v646_v52, 0.0 }
 0x1b2   : > { %v1065_v49 = vpop.f32.mrf.mxu1 }
 0x1b3   : > { %v649_v51 = vadd.f32 %v1065_v49, %v959_v20  ;;  %1090 = vmatprep.mubr.bf16.mxu0 %v686_v47  ;;  %v676_v57 = vmax.f32 %v638_v50, 0.0 }
 0x1b4   : > { %v640_v53 = vpop.f32.mrf.mxu1  ;;  %1091 = vmatmul.mubr.bf16.gmra.mxu0 %v687_v48 }
 0x1b5   : > { %v641_v54 = vadd.f32 %v959_v20, %v640_v53  ;;  %v679_v55 = vmax.f32 %v649_v51, 0.0 }
 0x1b6   : > { %v1068_v56 = vpop.f32.mrf.mxu1 }
 0x1b7   : > { %v677_v58 = vmax.f32 %v641_v54, 0.0  ;;  %v689_v62 = vpack.c.bf16 %v679_v55, %v678_v59  ;;  %v662_v2 = vadd.f32 %v1068_v56, %v959_v20 }
 0x1b8   : > { %v653_v60 = vpop.f32.mrf.mxu1 }
 0x1b9   : > { %v688_v61 = vpack.c.bf16 %v677_v58, %v676_v57  ;;  %v654_v0 = vadd.f32 %v959_v20, %v653_v60  ;;  %v682_v8 = vmax.f32 %v662_v2, 0.0 }
 0x1ba   : > { %v1069_v63 = vpop.f32.mrf.mxu1 }
 0x1bb   : > { %v665_v1 = vadd.f32 %v1069_v63, %v959_v20  ;;  %1094 = vmatprep.mubr.bf16.mxu0 %v688_v61  ;;  %v680_v6 = vmax.f32 %v654_v0, 0.0 }
 0x1bc   : > { %v656_v3 = vpop.f32.mrf.mxu1  ;;  %1095 = vmatmul.mubr.bf16.gmra.mxu0 %v689_v62 }
 0x1bd   : > { %v657_v4 = vadd.f32 %v959_v20, %v656_v3  ;;  %v683_v5 = vmax.f32 %v665_v1, 0.0 }
 0x1bf   : > { %v681_v7 = vmax.f32 %v657_v4, 0.0  ;;  %v691_v10 = vpack.c.bf16 %v683_v5, %v682_v8 }
 0x1c1   : > { %v690_v9 = vpack.c.bf16 %v681_v7, %v680_v6 }
 0x1c3   : > { %1098 = vmatprep.mubr.bf16.mxu0 %v690_v9 }
 0x1c4   : > { %1099 = vmatmul.mubr.bf16.gmra.mxu0 %v691_v10 }
 0x26c   : > { %v1088_v12 = vpop.f32.mrf.mxu0 }
 0x26d   : > { %v806_v13 = vadd.f32 %v1088_v12, %v968_v11 }
 0x26e   : > { %v797_v14 = vpop.f32.mrf.mxu0 }
 0x26f   : > { %862 = vst [vmem:[%s1269_s9 + $0x10] sm:$0xff] %v806_v13  ;;  %v798_v15 = vadd.f32 %v968_v11, %v797_v14 }
 0x270   : > { %v1089_v16 = vpop.f32.mrf.mxu0 }
 0x271   : > { %860 = vst [vmem:[%s1269_s9] sm:$0xff] %v798_v15  ;;  %v809_v17 = vadd.f32 %v1089_v16, %v968_v11 }
 0x272   : > { %v800_v18 = vpop.f32.mrf.mxu0 }
 0x273   : > { %863 = vst [vmem:[%s1269_s9 + $0x18] sm:$0xff] %v809_v17  ;;  %v801_v19 = vadd.f32 %v968_v11, %v800_v18 }
 0x274   : > { %v1092_v20 = vpop.f32.mrf.mxu0 }
 0x275   : > { %861 = vst [vmem:[%s1269_s9 + $0x8] sm:$0xff] %v801_v19  ;;  %v822_v21 = vadd.f32 %v1092_v20, %v968_v11 }
 0x276   : > { %v813_v22 = vpop.f32.mrf.mxu0 }
 0x277   : > { %866 = vst [vmem:[%s1269_s9 + $0x30] sm:$0xff] %v822_v21  ;;  %v814_v23 = vadd.f32 %v968_v11, %v813_v22 }
 0x278   : > { %v1093_v24 = vpop.f32.mrf.mxu0 }
 0x279   : > { %864 = vst [vmem:[%s1269_s9 + $0x20] sm:$0xff] %v814_v23  ;;  %v825_v25 = vadd.f32 %v1093_v24, %v968_v11 }
 0x27a   : > { %v816_v26 = vpop.f32.mrf.mxu0 }
 0x27b   : > { %867 = vst [vmem:[%s1269_s9 + $0x38] sm:$0xff] %v825_v25  ;;  %v817_v27 = vadd.f32 %v968_v11, %v816_v26 }
 0x27c   : > { %v1096_v28 = vpop.f32.mrf.mxu0 }
 0x27d   : > { %865 = vst [vmem:[%s1269_s9 + $0x28] sm:$0xff] %v817_v27  ;;  %v838_v29 = vadd.f32 %v1096_v28, %v968_v11 }
 0x27e   : > { %v829_v30 = vpop.f32.mrf.mxu0 }
 0x27f   : > { %870 = vst [vmem:[%s1269_s9 + $0x50] sm:$0xff] %v838_v29  ;;  %v830_v31 = vadd.f32 %v968_v11, %v829_v30 }
 0x280   : > { %v1097_v32 = vpop.f32.mrf.mxu0 }
 0x281   : > { %868 = vst [vmem:[%s1269_s9 + $0x40] sm:$0xff] %v830_v31  ;;  %v841_v33 = vadd.f32 %v1097_v32, %v968_v11 }
 0x282   : > { %v832_v34 = vpop.f32.mrf.mxu0 }
 0x283   : > { %871 = vst [vmem:[%s1269_s9 + $0x58] sm:$0xff] %v841_v33  ;;  %v833_v35 = vadd.f32 %v968_v11, %v832_v34 }
 0x284   : > { %v1100_v36 = vpop.f32.mrf.mxu0 }
 0x285   : > { %869 = vst [vmem:[%s1269_s9 + $0x48] sm:$0xff] %v833_v35  ;;  %v854_v37 = vadd.f32 %v1100_v36, %v968_v11 }
 0x286   : > { %v845_v38 = vpop.f32.mrf.mxu0 }
 0x287   : > { %874 = vst [vmem:[%s1269_s9 + $0x70] sm:$0xff] %v854_v37  ;;  %v846_v39 = vadd.f32 %v968_v11, %v845_v38 }
 0x288   : > { %v1101_v40 = vpop.f32.mrf.mxu0 }
 0x289   : > { %872 = vst [vmem:[%s1269_s9 + $0x60] sm:$0xff] %v846_v39  ;;  %v857_v41 = vadd.f32 %v1101_v40, %v968_v11 }
 0x28a   : > { %v848_v42 = vpop.f32.mrf.mxu0 }
 0x28b   : > { %875 = vst [vmem:[%s1269_s9 + $0x78] sm:$0xff] %v857_v41  ;;  %v849_v43 = vadd.f32 %v968_v11, %v848_v42 }
 0x28d   : > { %873 = vst [vmem:[%s1269_s9 + $0x68] sm:$0xff] %v849_v43 }
 0x28e PF: > { %s17_s24 = sadd.s32 1, %s1141_s24  }
 0x28f   : > { %p14_p4 = scmp.ge.s32.totalorder %s17_s24, 4  }
 0x291   :  { %16 = sbr.rel (!%p14_p4) target bundleno = 1 (0x1), region = 78 }

</bundles_post_ra>
